<compile_context>
chip_gen: v7x
topology: tpu7x:2x2x1
jax: 0.10.0
libtpu: 0.0.40
codegen_flags: <defaults>
</compile_context>

<pallas_src>
import functools

import jax
import jax.numpy as jnp
import numpy as np
from jax import lax
from jax.experimental import pallas as pl
from jax.experimental.pallas import tpu as pltpu

_LANES = 512          # lane-dense last dim (multiple of 128 -> unmasked vst)
_MAX_ROW_TILE = 512   # 512 x 512 f32 = 1 MiB per plane buffer


def _threshold_i32(p):
    """Signed int32 threshold t with P(u < t) = 1-p for u uniform int32."""
    keep = 1.0 - float(p)
    t = int(round(keep * 4294967296.0)) - 2147483648
    return max(-2147483648, min(t, 2147483647))


def _mask_from_bits(bits_i32, threshold, scale):
    return jnp.where(bits_i32 < jnp.int32(threshold),
                     jnp.float32(scale), jnp.float32(0.0))


def _dropout_kernel_hwprng(seed_ref, re_ref, im_ref, re_out, im_out, *,
                           threshold, scale):
    """TPU path: mask drawn in-kernel from the hardware PRNG (no mask HBM)."""
    pltpu.prng_seed(seed_ref[0], pl.program_id(0))
    bits = pltpu.bitcast(pltpu.prng_random_bits(re_ref.shape), jnp.int32)
    mask = _mask_from_bits(bits, threshold, scale)
    re_out[...] = re_ref[...] * mask          # SAME mask for both planes
    im_out[...] = im_ref[...] * mask


def _dropout_kernel_bits(bits_ref, re_ref, im_ref, re_out, im_out, *,
                         threshold, scale):
    """Portable path (CPU / interpret fallback): bits streamed in as input."""
    mask = _mask_from_bits(bits_ref[...], threshold, scale)
    re_out[...] = re_ref[...] * mask
    im_out[...] = im_ref[...] * mask


def _pick_row_tile(rows):
    """rows is a multiple of 8.  Biggest tile <= 512; grid >= 2 when possible."""
    if rows <= 16:
        return rows                                   # single full-dim block
    return min(_MAX_ROW_TILE, max(8, ((rows // 2) // 8) * 8))


@functools.partial(jax.jit, static_argnames=("p", "use_hw_prng"))
def _complex_dropout_impl(x, seed, *, p, use_hw_prng):
    orig_shape = x.shape
    re = jnp.real(x).astype(jnp.float32).reshape(-1)
    im = jnp.imag(x).astype(jnp.float32).reshape(-1)
    n = re.size

    rows = ((pl.cdiv(n, _LANES) + 7) // 8) * 8        # rows -> multiple of 8
    n_pad = rows * _LANES - n
    if n_pad:
        # tail-only pad (< 8 rows of 512); fuses with real/imag extraction
        re = jnp.pad(re, (0, n_pad))
        im = jnp.pad(im, (0, n_pad))
    re = re.reshape(rows, _LANES)
    im = im.reshape(rows, _LANES)

    row_tile = _pick_row_tile(rows)
    grid = (pl.cdiv(rows, row_tile),)

    threshold = _threshold_i32(p)
    scale = 1.0 / (1.0 - float(p))

    plane_spec = pl.BlockSpec((row_tile, _LANES), lambda r: (r, 0))

    if use_hw_prng:
        kernel = functools.partial(_dropout_kernel_hwprng,
                                   threshold=threshold, scale=scale)
        rng_in = seed.astype(jnp.int32).reshape((1,))
        rng_spec = pl.BlockSpec(memory_space=pltpu.MemorySpace.SMEM)
    else:
        kernel = functools.partial(_dropout_kernel_bits,
                                   threshold=threshold, scale=scale)
        bits = jax.random.bits(jax.random.PRNGKey(seed), (rows, _LANES),
                               dtype=jnp.uint32)
        rng_in = lax.bitcast_convert_type(bits, jnp.int32)
        rng_spec = plane_spec

    re_out, im_out = pl.pallas_call(
        kernel,
        out_shape=(jax.ShapeDtypeStruct((rows, _LANES), jnp.float32),
                   jax.ShapeDtypeStruct((rows, _LANES), jnp.float32)),
        grid=grid,
        in_specs=[rng_spec, plane_spec, plane_spec],
        out_specs=(plane_spec, plane_spec),
        input_output_aliases={1: 0, 2: 1},            # re->re_out, im->im_out
        compiler_params=pltpu.CompilerParams(
            dimension_semantics=("parallel",)),
        cost_estimate=pl.CostEstimate(
            flops=4 * rows * _LANES,
            transcendentals=0,
            bytes_accessed=4 * rows * _LANES * 4),
    )(rng_in, re, im)

    re_out = re_out.reshape(-1)[:n]
    im_out = im_out.reshape(-1)[:n]
    return lax.complex(re_out, im_out).reshape(orig_shape)


def complex_dropout(x, p=0.5, seed=0, training=True):
    """Dropout with a mask shared by real & imaginary parts (complexPyTorch)."""
    if not training or p <= 0.0:
        return x
    if p >= 1.0:
        return jnp.zeros_like(x)
    if not jnp.issubdtype(x.dtype, jnp.complexfloating):
        x = x.astype(jnp.complex64)
    use_hw_prng = jax.default_backend() == "tpu"
    seed_arr = jnp.asarray(seed, dtype=jnp.int32)
    return _complex_dropout_impl(x, seed_arr, p=float(p),
                                 use_hw_prng=use_hw_prng)


class ComplexDropout:
    """Mirror of complexPyTorch's ComplexDropout (no learnable parameters)."""

    def __init__(self, p=0.5):
        self.p = p
        self.training = True

    def train(self, mode=True):
        self.training = mode
        return self

    def eval(self):
        self.training = False
        return self

    def __call__(self, x, seed=0):
        return complex_dropout(x, self.p, seed=seed, training=self.training)


if __name__ == "__main__":
    key = jax.random.PRNGKey(0)
    kr, ki, ks = jax.random.split(key, 3)
    B, C, H, W = 2, 4, 16, 16
    xr = jax.random.normal(kr, (B, C, H, W), dtype=jnp.float32)
    xi = jax.random.normal(ki, (B, C, H, W), dtype=jnp.float32)
    x = (xr + 1j * xi).astype(jnp.complex64)
    seed = int(jax.random.randint(ks, (), 0, 2**31 - 1))

    p = 0.5
    layer = ComplexDropout(p=p)                 # training mode by default
    out = jax.block_until_ready(layer(x, seed=seed))

    assert out.shape == x.shape, out.shape
    assert out.dtype == jnp.complex64, out.dtype

    out_np = np.asarray(out)
    x_np = np.asarray(x)
    zero_re = out_np.real == 0.0
    zero_im = out_np.imag == 0.0
    # The SAME mask must hit real and imaginary parts.
    assert np.array_equal(zero_re, zero_im), "mask differs between re and im"
    kept = ~zero_re
    # Kept elements are exactly input * 1/(1-p).
    np.testing.assert_allclose(out_np[kept], x_np[kept] / (1.0 - p), rtol=1e-6)
    # Drop fraction is statistically sane (N = 2048, very loose band).
    frac = 1.0 - kept.mean()
    assert abs(frac - p) < 0.15, f"drop fraction {frac} far from p={p}"

    # eval mode is the identity.
    layer.eval()
    out_eval = jax.block_until_ready(layer(x))
    assert np.array_equal(np.asarray(out_eval), x_np)

    print("KERNEL_OK")
</pallas_src>

<mosaic_0001>
module attributes {stable_mosaic.version = 11 : i64} {
  func.func @_dropout_kernel_bits(%arg0: i32, %arg1: memref<8x512xi32, #tpu.memory_space<vmem>>, %arg2: memref<8x512xf32, #tpu.memory_space<vmem>>, %arg3: memref<8x512xf32, #tpu.memory_space<vmem>>, %arg4: memref<8x512xf32, #tpu.memory_space<vmem>>, %arg5: memref<8x512xf32, #tpu.memory_space<vmem>>) attributes {dimension_semantics = [#tpu.dimension_semantics<parallel>], iteration_bounds = array<i64: 1>, scalar_prefetch = 0 : i64, scratch_operands = 0 : i64, tpu.core_type = #tpu.core_type<tc>, window_params = [{transform_indices = @transform_0, window_bounds = array<i64: 8, 512>}, {transform_indices = @transform_1, window_bounds = array<i64: 8, 512>}, {transform_indices = @transform_2, window_bounds = array<i64: 8, 512>}, {transform_indices = @transform_3, window_bounds = array<i64: 8, 512>}, {transform_indices = @transform_4, window_bounds = array<i64: 8, 512>}]} {
    %c0 = arith.constant 0 : index
    %c0_0 = arith.constant 0 : index
    %0 = vector.load %arg1[%c0, %c0_0] : memref<8x512xi32, #tpu.memory_space<vmem>>, vector<8x512xi32>
    %c0_i32 = arith.constant 0 : i32
    %1 = vector.broadcast %c0_i32 : i32 to vector<8x512xi32>
    %2 = arith.cmpi slt, %0, %1 : vector<8x512xi32>
    %cst = arith.constant 2.000000e+00 : f32
    %cst_1 = arith.constant 0.000000e+00 : f32
    %3 = vector.broadcast %cst : f32 to vector<8x512xf32>
    %4 = vector.broadcast %cst_1 : f32 to vector<8x512xf32>
    %5 = arith.select %2, %3, %4 : vector<8x512xi1>, vector<8x512xf32>
    %c0_2 = arith.constant 0 : index
    %c0_3 = arith.constant 0 : index
    %6 = vector.load %arg2[%c0_2, %c0_3] : memref<8x512xf32, #tpu.memory_space<vmem>>, vector<8x512xf32>
    %7 = arith.mulf %6, %5 : vector<8x512xf32>
    %c0_4 = arith.constant 0 : index
    %c0_5 = arith.constant 0 : index
    %8 = vector.load %arg4[%c0_4, %c0_5] : memref<8x512xf32, #tpu.memory_space<vmem>>, vector<8x512xf32>
    tpu.vector_store %arg4[%c0_4, %c0_5], %7 {strides = array<i32>} : memref<8x512xf32, #tpu.memory_space<vmem>>, vector<8x512xf32>,
    %c0_6 = arith.constant 0 : index
    %c0_7 = arith.constant 0 : index
    %9 = vector.load %arg3[%c0_6, %c0_7] : memref<8x512xf32, #tpu.memory_space<vmem>>, vector<8x512xf32>
    %10 = arith.mulf %9, %5 : vector<8x512xf32>
    %c0_8 = arith.constant 0 : index
    %c0_9 = arith.constant 0 : index
    %11 = vector.load %arg5[%c0_8, %c0_9] : memref<8x512xf32, #tpu.memory_space<vmem>>, vector<8x512xf32>
    tpu.vector_store %arg5[%c0_8, %c0_9], %10 {strides = array<i32>} : memref<8x512xf32, #tpu.memory_space<vmem>>, vector<8x512xf32>,
    return
  }
  func.func @transform_0(%arg0: i32) -> (i32, i32) {
    %c0_i32 = arith.constant 0 : i32
    %c0_i32_0 = arith.constant 0 : i32
    return %arg0, %c0_i32 : i32, i32
  }
  func.func @transform_1(%arg0: i32) -> (i32, i32) {
    %c0_i32 = arith.constant 0 : i32
    %c0_i32_0 = arith.constant 0 : i32
    return %arg0, %c0_i32 : i32, i32
  }
  func.func @transform_2(%arg0: i32) -> (i32, i32) {
    %c0_i32 = arith.constant 0 : i32
    %c0_i32_0 = arith.constant 0 : i32
    return %arg0, %c0_i32 : i32, i32
  }
  func.func @transform_3(%arg0: i32) -> (i32, i32) {
    %c0_i32 = arith.constant 0 : i32
    %c0_i32_0 = arith.constant 0 : i32
    return %arg0, %c0_i32 : i32, i32
  }
  func.func @transform_4(%arg0: i32) -> (i32, i32) {
    %c0_i32 = arith.constant 0 : i32
    %c0_i32_0 = arith.constant 0 : i32
    return %arg0, %c0_i32 : i32, i32
  }
}

</mosaic_0001>

<bundles_post_ra>
// kernel: custom-call.1
= control target key start
LH: loop header
LB: loop body
LE: loop exit
PB: predicated region body
PF: predicated region fallthrough
CT: control target
= control target key end

     0   :  { %s59_s0 = inlined_call_operand.hbm [shape: c64[2,4,16,16], index: 0, kind: input, shape index: {}]   ;;  %s60_s1 = inlined_call_operand.vmem [shape: f32[2,4,16,16], index: 1, kind: output, shape index: {}]  }
   0x1   :  { %s2_s8 = scalar_lea.hbm %s59_s0, 2048 }
   0x2   :  { %3 = vsyncpa [#allocation0], 0  ;;  %s4_s11 = sshll.u32 %s60_s1, 4  ;;  %s34_s14 = scalar_lea.hbm %s59_s0, 4096  ;;  %s5_s11 = int_to_ptr.vmem [resolvable:$true] %s4_s11 }
   0x3   :  { %p11_p0 = scmp.ne.s32.totalorder %s2_s8, %s34_s14  ;;  %p13_p1 = scmp.lt.u32.totalorder %s2_s8, %s59_s0 }
   0x4   :  { %p14_p2 = scmp.lt.u32.totalorder %s34_s14, %s34_s14  ;;  %p16_p4 = scmp.lt.u32.totalorder %s34_s14, %s2_s8 }
   0x6   :  { %p15_p3 = por %p14_p2, %p13_p1 }
   0x8   :  { %p17_p5 = por %p16_p4, %p15_p3 }
   0xa   :  { %p18_p6 = pnand %p17_p5, %p11_p0 }
   0xc   :  { %21 = shalt.err (!%p18_p6)  }
   0xd   :  { %s22_s17 = scalar_lea.vmem %s5_s11, 2048  ;;  %p27_p8 = scmp.lt.s32.totalorder %s5_s11, %s5_s11 }
   0xe   :  { %p23_p7 = scmp.ne.s32.totalorder %s5_s11, %s22_s17  ;;  %p28_p9 = scmp.lt.s32.totalorder %s22_s17, %s22_s17 }
  0x10   :  { %p29_p10 = por %p28_p9, %p27_p8 }
  0x12   :  { %p30_p11 = pnand %p29_p10, %p23_p7 }
  0x14   :  { %33 = shalt.err (!%p30_p11)  }
  0x15   :  { %7 = dma.hbm_to_vmem [thread:$0]  %s2_s8, 2048, %s5_s11, [#allocation0] }
  0x16   :  { %35 = dma.done.wait [#allocation0], 2048  }
  0x17   :  { %36 = vsyncadd [#allocation0], 4294965248 }
  0x18   :  { %9 = vsyncpa [#allocation0], 1 }

// kernel: custom-call
= control target key start
LH: loop header
LB: loop body
LE: loop exit
PB: predicated region body
PF: predicated region fallthrough
CT: control target
= control target key end

     0   :  { %2 = vsyncpa [#allocation0], 0  ;;  %s61_s0 = inlined_call_operand.hbm [shape: c64[2,4,16,16], index: 0, kind: input, shape index: {}]   ;;  %s62_s1 = inlined_call_operand.vmem [shape: f32[2,4,16,16], index: 1, kind: output, shape index: {}]  }
   0x1   :  { %s3_s8 = sshll.u32 %s62_s1, 4  ;;  %s9_s11 = scalar_lea.hbm %s61_s0, 2048  ;;  %s4_s8 = int_to_ptr.vmem [resolvable:$true] %s3_s8 }
   0x2   :  { %p10_p0 = scmp.ne.s32.totalorder %s61_s0, %s9_s11  ;;  %s11_s16 = scalar_lea.hbm %s61_s0, 4096 }
   0x3   :  { %p12_p1 = scmp.lt.u32.totalorder %s11_s16, %s9_s11  ;;  %p13_p2 = scmp.lt.u32.totalorder %s9_s11, %s61_s0 }
   0x5   :  { %p14_p3 = por %p13_p2, %p12_p1 }
   0x7   :  { %p15_p4 = pnand %p14_p3, %p10_p0 }
   0x9   :  { %18 = shalt.err (!%p15_p4)  }
   0xa   :  { %s19_s1 = scalar_lea.vmem %s4_s8, 2048  ;;  %p24_p6 = scmp.lt.s32.totalorder %s4_s8, %s4_s8 }
   0xb   :  { %p20_p5 = scmp.ne.s32.totalorder %s4_s8, %s19_s1  ;;  %p25_p7 = scmp.lt.s32.totalorder %s19_s1, %s19_s1 }
   0xd   :  { %p26_p8 = por %p25_p7, %p24_p6 }
   0xf   :  { %p27_p9 = pnand %p26_p8, %p20_p5 }
  0x11   :  { %30 = shalt.err (!%p27_p9)  }
  0x12   :  { %6 = dma.hbm_to_vmem [thread:$0]  %s61_s0, 2048, %s4_s8, [#allocation0] }
  0x13   :  { %31 = dma.done.wait [#allocation0], 2048  }
  0x14   :  { %32 = vsyncadd [#allocation0], 4294965248 }
  0x15   :  { %8 = vsyncpa [#allocation0], 1 }

// kernel: custom-call.2
= control target key start
LH: loop header
LB: loop body
LE: loop exit
PB: predicated region body
PF: predicated region fallthrough
CT: control target
= control target key end

     0   :  { %s126_s0 = inlined_call_operand.vmem [shape: f32[2,4,16,16], index: 0, kind: input, shape index: {}]   ;;  %s127_s1 = inlined_call_operand.vmem [shape: f32[2,4,16,16], index: 1, kind: input, shape index: {}]   ;;  %s128_s2 = inlined_call_operand.hbm [shape: c64[2,4,16,16], index: 2, kind: output, shape index: {}]  }
   0x1   :  { %s87_s11 = scalar_lea.hbm %s128_s2, 2048 }
   0x2   :  { %4 = vsyncpa [#allocation0], 0  ;;  %s5_s14 = sshll.u32 %s126_s0, 4  ;;  %s6_s14 = int_to_ptr.vmem [resolvable:$true] %s5_s14 }
   0x3   :  { %s18_s15 = scalar_lea.vmem %s6_s14, 2048  ;;  %p23_p1 = scmp.lt.s32.totalorder %s6_s14, %s6_s14 }
   0x4   :  { %p19_p0 = scmp.ne.s32.totalorder %s6_s14, %s18_s15  ;;  %p24_p2 = scmp.lt.s32.totalorder %s18_s15, %s18_s15 }
   0x6   :  { %p25_p3 = por %p24_p2, %p23_p1 }
   0x8   :  { %p26_p4 = pnand %p25_p3, %p19_p0 }
   0xa   :  { %29 = shalt.err (!%p26_p4)  }
   0xb   :  { %p31_p5 = scmp.ne.s32.totalorder %s128_s2, %s87_s11  ;;  %s32_s0 = scalar_lea.hbm %s128_s2, 4096 }
   0xc   :  { %p33_p6 = scmp.lt.u32.totalorder %s32_s0, %s87_s11  ;;  %p34_p7 = scmp.lt.u32.totalorder %s87_s11, %s128_s2 }
   0xe   :  { %p35_p8 = por %p34_p7, %p33_p6 }
  0x10   :  { %p36_p9 = pnand %p35_p8, %p31_p5 }
  0x12   :  { %39 = shalt.err (!%p36_p9)  }
  0x13   :  { %8 = dma.vmem_to_hbm [thread:$0]  %s6_s14, 2048, %s128_s2, [#allocation0] }
  0x14   :  { %65 = dma.done.wait [#allocation0], 2048  }
  0x15   :  { %66 = vsyncadd [#allocation0], 4294965248 }
  0x16   :  { %10 = vsyncpa [#allocation0], 1 }
  0x17   :  { %11 = vsyncpa [#allocation1], 0  ;;  %s12_s28 = sshll.u32 %s127_s1, 4  ;;  %s13_s28 = int_to_ptr.vmem [resolvable:$true] %s12_s28 }
  0x18   :  { %s40_s29 = scalar_lea.vmem %s13_s28, 2048  ;;  %p45_p11 = scmp.lt.s32.totalorder %s13_s28, %s13_s28 }
  0x19   :  { %p41_p10 = scmp.ne.s32.totalorder %s13_s28, %s40_s29  ;;  %p46_p12 = scmp.lt.s32.totalorder %s40_s29, %s40_s29 }
  0x1b   :  { %p47_p13 = por %p46_p12, %p45_p11 }
  0x1d   :  { %p48_p0 = pnand %p47_p13, %p41_p10 }
  0x1f   :  { %51 = shalt.err (!%p48_p0)  }
  0x20   :  { %p53_p1 = scmp.ne.s32.totalorder %s87_s11, %s32_s0  ;;  %p56_p2 = scmp.lt.u32.totalorder %s32_s0, %s32_s0 }
  0x22   :  { %p57_p3 = por %p56_p2, %p34_p7 }
  0x24   :  { %p59_p4 = por %p57_p3, %p33_p6 }
  0x26   :  { %p60_p5 = pnand %p59_p4, %p53_p1 }
  0x28   :  { %63 = shalt.err (!%p60_p5)  }
  0x29   :  { %15 = dma.vmem_to_hbm [thread:$0]  %s13_s28, 2048, %s87_s11, [#allocation1] }
  0x2a   :  { %67 = dma.done.wait [#allocation1], 2048  }
  0x2b   :  { %68 = vsyncadd [#allocation1], 4294965248 }
  0x2c   :  { %17 = vsyncpa [#allocation1], 1 }

// kernel: _complex_dropout_impl.1
= control target key start
LH: loop header
LB: loop body
LE: loop exit
PB: predicated region body
PF: predicated region fallthrough
CT: control target
= control target key end

     0   :  { %v61_v6 = vmov 0.0   ;;  %s147_s0 = inlined_call_operand.vmem [shape: s32[8,512], index: 0, kind: input, shape index: {}]   ;;  %s148_s1 = inlined_call_operand.vmem [shape: f32[8,512], index: 1, kind: input, shape index: {}, may-alias: {1,3}]   ;;  %s149_s2 = inlined_call_operand.vmem [shape: f32[8,512], index: 2, kind: input, shape index: {}, may-alias: {2,4}]   ;;  %s150_s3 = inlined_call_operand.vmem [shape: f32[8,512], index: 3, kind: output, shape index: {0}, may-alias: {1,3}]   ;;  %s151_s4 = inlined_call_operand.vmem [shape: f32[8,512], index: 4, kind: output, shape index: {1}, may-alias: {2,4}]  }
   0x1   :  { %v16_v0 = vld [vmem:[%s147_s0] sm:$0xff]  ;;  %v17_v2 = vld [vmem:[%s147_s0 + $0x8] sm:$0xff]  ;;  %v18_v4 = vld [vmem:[%s147_s0 + $0x10] sm:$0xff] }
   0x2   :  { %v28_v1 = vld [vmem:[%s148_s1] sm:$0xff]  ;;  %vm20_vm0 = vcmp.lt.s32.totalorder %v16_v0, 0  ;;  %vm21_vm1 = vcmp.lt.s32.totalorder %v17_v2, 0  ;;  %v29_v3 = vld [vmem:[%s148_s1 + $0x8] sm:$0xff]  ;;  %v30_v5 = vld [vmem:[%s148_s1 + $0x10] sm:$0xff]  ;;  %vm22_vm2 = vcmp.lt.s32.totalorder %v18_v4, 0 }
   0x3   :  { %v24_v7 = vsel %vm20_vm0, 2.0, %v61_v6  ;;  %v25_v8 = vsel %vm21_vm1, 2.0, %v61_v6  ;;  %v19_v9 = vld [vmem:[%s147_s0 + $0x18] sm:$0xff]  ;;  %v40_v11 = vld [vmem:[%s149_s2] sm:$0xff]  ;;  %v26_v14 = vsel %vm22_vm2, 2.0, %v61_v6  ;;  %v41_v15 = vld [vmem:[%s149_s2 + $0x8] sm:$0xff] }
   0x4   :  { %v31_v10 = vld [vmem:[%s148_s1 + $0x18] sm:$0xff]  ;;  %v32_v12 = vmul.f32 %v28_v1, %v24_v7  ;;  %v33_v13 = vmul.f32 %v29_v3, %v25_v8  ;;  %vm23_vm3 = vcmp.lt.s32.totalorder %v19_v9, 0  ;;  %v42_v16 = vld [vmem:[%s149_s2 + $0x10] sm:$0xff]  ;;  %v34_v18 = vmul.f32 %v30_v5, %v26_v14 }
   0x5   :  { %v43_v17 = vld [vmem:[%s149_s2 + $0x18] sm:$0xff]  ;;  %v27_v19 = vsel %vm23_vm3, 2.0, %v61_v6  ;;  %v44_v20 = vmul.f32 %v40_v11, %v24_v7  ;;  %v45_v21 = vmul.f32 %v41_v15, %v25_v8  ;;  %v46_v23 = vmul.f32 %v42_v16, %v26_v14 }
   0x6   :  { %36 = vst [vmem:[%s150_s3] sm:$0xff] %v32_v12  ;;  %37 = vst [vmem:[%s150_s3 + $0x8] sm:$0xff] %v33_v13  ;;  %v35_v22 = vmul.f32 %v31_v10, %v27_v19  ;;  %v47_v24 = vmul.f32 %v43_v17, %v27_v19 }
   0x7   :  { %38 = vst [vmem:[%s150_s3 + $0x10] sm:$0xff] %v34_v18  ;;  %48 = vst [vmem:[%s151_s4] sm:$0xff] %v44_v20 }
   0x8   :  { %49 = vst [vmem:[%s151_s4 + $0x8] sm:$0xff] %v45_v21  ;;  %39 = vst [vmem:[%s150_s3 + $0x18] sm:$0xff] %v35_v22 }
   0x9   :  { %50 = vst [vmem:[%s151_s4 + $0x10] sm:$0xff] %v46_v23  ;;  %51 = vst [vmem:[%s151_s4 + $0x18] sm:$0xff] %v47_v24 }

</bundles_post_ra>
